<compile_context>
chip_gen: v5e
topology: v5e:2x2
jax: 0.10.0
libtpu: 0.0.40
codegen_flags: <defaults>
</compile_context>

<pallas_src>
import math

import jax
import jax.numpy as jnp
from jax.experimental import pallas as pl
from jax.experimental.pallas import tpu as pltpu


# Below this many elements per model output, XLA's fusion beats a kernel launch.
_PALLAS_MIN_ELEMS = 8192
# Byte budget shared by all double-buffered pipeline blocks (K inputs + output).
_VMEM_BLOCK_BUDGET = 20 * 1024 * 1024


def _round_up(x, m):
    return ((x + m - 1) // m) * m


def _switch_lse_kernel(logpost_ref, *refs):
    """Unrolled log-sum-exp over K model tiles.

    logpost_ref: (K,) f32 in SMEM  -- per-model log posterior (scalar adds)
    refs[:-1]:   K tiles (TR, L)   -- one lane-dense tile per model
    refs[-1]:    (TR, L) output tile
    """
    x_refs = refs[:-1]
    o_ref = refs[-1]
    k_models = len(x_refs)

    # f32 accumulation regardless of input dtype (required on v5e, free elsewhere).
    xs = [x_refs[k][...].astype(jnp.float32) + logpost_ref[k] for k in range(k_models)]

    m = xs[0]
    for k in range(1, k_models):
        m = jnp.maximum(m, xs[k])          # VPU elementwise, no cross-lane reduce

    s = jnp.exp(xs[0] - m)                 # EUP transcendental slot
    for k in range(1, k_models):
        s = s + jnp.exp(xs[k] - m)

    o_ref[...] = (m + jnp.log(s)).astype(o_ref.dtype)


def _switch_forward_reference(lst_logpx, logposterior):
    """Pure-JAX reference / small-input fast path."""
    x = jnp.stack(lst_logpx, axis=-1) + logposterior.astype(jnp.float32)
    return jax.scipy.special.logsumexp(x, axis=-1).astype(lst_logpx[0].dtype)


def switch_forward(lst_logpx, logposterior, force_pallas=False):
    """Pallas implementation of Switch.forward."""
    k_models = len(lst_logpx)
    out_shape = lst_logpx[0].shape
    dtype = jnp.result_type(*lst_logpx)
    n = int(math.prod(out_shape))
    logpost = logposterior.astype(jnp.float32)

    if not force_pallas and n < _PALLAS_MIN_ELEMS:
        # Tiny inputs: per-step / launch overhead dominates; XLA fusion wins.
        return _switch_forward_reference(lst_logpx, logpost)

    # Lane-dense 2-D view: the LSE over K is purely elementwise over the
    # flattened B*C elements, so flattening is semantically free.
    lanes = 512 if n >= 8 * 512 else 128
    rows = -(-n // lanes)

    itemsize = jnp.dtype(dtype).itemsize
    per_block = _VMEM_BLOCK_BUDGET // (2 * k_models + 2)   # K ins + out, 2x buffered
    tile_rows = per_block // (lanes * itemsize)
    tile_rows = max(8, min(1024, (tile_rows // 8) * 8))
    tile_rows = min(tile_rows, _round_up(rows, 8))
    rows_pad = _round_up(rows, tile_rows)
    n_pad = rows_pad * lanes

    def _prep(x):
        xf = x.astype(dtype).reshape(-1)
        if n_pad != n:
            xf = jnp.pad(xf, (0, n_pad - n))
        return xf.reshape(rows_pad, lanes)

    xs = [_prep(x) for x in lst_logpx]

    tile_spec = pl.BlockSpec((tile_rows, lanes), lambda i: (i, 0))
    out2d = pl.pallas_call(
        _switch_lse_kernel,
        out_shape=jax.ShapeDtypeStruct((rows_pad, lanes), dtype),
        grid=(rows_pad // tile_rows,),
        in_specs=[pl.BlockSpec(memory_space=pltpu.MemorySpace.SMEM)]
        + [tile_spec] * k_models,
        out_specs=tile_spec,
        compiler_params=pltpu.CompilerParams(
            dimension_semantics=("parallel",),
            vmem_limit_bytes=32 * 1024 * 1024,
        ),
    )(logpost, *xs)

    return out2d.reshape(-1)[:n].reshape(out_shape)


def make_switch_buffers(nb_models, theta=0.9999):
    """Deterministic init mirroring Switch.__init__ (buffers only)."""
    logw = jnp.stack(
        [
            jnp.full((nb_models,), math.log(theta), dtype=jnp.float32),
            jnp.full((nb_models,), math.log(1.0 - theta), dtype=jnp.float32),
        ],
        axis=0,
    ) - math.log(nb_models)                                # (2, K); unused by forward
    logposterior = jnp.full((nb_models,), -math.log(nb_models), dtype=jnp.float32)
    return logw, logposterior


if __name__ == "__main__":
    nb_models = 4
    key = jax.random.PRNGKey(0)
    _, logposterior = make_switch_buffers(nb_models, theta=0.9999)

    # --- tiny demo at the module's natural shapes (batch=2, nclass=10) -------
    batch, nclass = 2, 10
    keys = jax.random.split(key, nb_models)
    lst_small = [
        jax.nn.log_softmax(
            jax.random.normal(k, (batch, nclass), dtype=jnp.float32), axis=-1
        )
        for k in keys
    ]
    out_small = switch_forward(lst_small, logposterior, force_pallas=True)
    out_small = jax.block_until_ready(out_small)
    ref_small = jax.scipy.special.logsumexp(
        jnp.stack(lst_small, axis=-1) + logposterior, axis=-1
    )
    assert out_small.shape == (batch, nclass)
    assert jnp.allclose(out_small, ref_small, atol=1e-5, rtol=1e-5)

    # --- moderately larger case to exercise the tiled, multi-block pipeline --
    batch2, nclass2 = 1024, 1024
    keys2 = jax.random.split(jax.random.fold_in(key, 1), nb_models)
    lst_big = [
        jax.nn.log_softmax(
            jax.random.normal(k, (batch2, nclass2), dtype=jnp.float32), axis=-1
        )
        for k in keys2
    ]
    out_big = switch_forward(lst_big, logposterior)
    out_big = jax.block_until_ready(out_big)
    ref_big = jax.scipy.special.logsumexp(
        jnp.stack(lst_big, axis=-1) + logposterior, axis=-1
    )
    assert out_big.shape == (batch2, nclass2)
    assert jnp.allclose(out_big, ref_big, atol=1e-5, rtol=1e-5)

    print("KERNEL_OK")
</pallas_src>

<mosaic_0001>
module attributes {stable_mosaic.version = 11 : i64} {
  func.func @_switch_lse_kernel(%arg0: i32, %arg1: memref<4xf32, #tpu.memory_space<smem>>, %arg2: memref<8x128xf32, #tpu.memory_space<vmem>>, %arg3: memref<8x128xf32, #tpu.memory_space<vmem>>, %arg4: memref<8x128xf32, #tpu.memory_space<vmem>>, %arg5: memref<8x128xf32, #tpu.memory_space<vmem>>, %arg6: memref<8x128xf32, #tpu.memory_space<vmem>>) attributes {dimension_semantics = [#tpu.dimension_semantics<parallel>], iteration_bounds = array<i64: 1>, scalar_prefetch = 0 : i64, scratch_operands = 0 : i64, tpu.core_type = #tpu.core_type<tc>, window_params = [{transform_indices = @transform_0, window_bounds = array<i64: 4>}, {transform_indices = @transform_1, window_bounds = array<i64: 8, 128>}, {transform_indices = @transform_2, window_bounds = array<i64: 8, 128>}, {transform_indices = @transform_3, window_bounds = array<i64: 8, 128>}, {transform_indices = @transform_4, window_bounds = array<i64: 8, 128>}, {transform_indices = @transform_5, window_bounds = array<i64: 8, 128>}]} {
    %c0 = arith.constant 0 : index
    %c0_0 = arith.constant 0 : index
    %0 = vector.load %arg2[%c0, %c0_0] : memref<8x128xf32, #tpu.memory_space<vmem>>, vector<8x128xf32>
    %c0_1 = arith.constant 0 : index
    %1 = memref.load %arg1[%c0_1] : memref<4xf32, #tpu.memory_space<smem>>
    %2 = vector.broadcast %1 : f32 to vector<8x128xf32>
    %3 = arith.addf %0, %2 : vector<8x128xf32>
    %c0_2 = arith.constant 0 : index
    %c0_3 = arith.constant 0 : index
    %4 = vector.load %arg3[%c0_2, %c0_3] : memref<8x128xf32, #tpu.memory_space<vmem>>, vector<8x128xf32>
    %c1 = arith.constant 1 : index
    %5 = memref.load %arg1[%c1] : memref<4xf32, #tpu.memory_space<smem>>
    %6 = vector.broadcast %5 : f32 to vector<8x128xf32>
    %7 = arith.addf %4, %6 : vector<8x128xf32>
    %c0_4 = arith.constant 0 : index
    %c0_5 = arith.constant 0 : index
    %8 = vector.load %arg4[%c0_4, %c0_5] : memref<8x128xf32, #tpu.memory_space<vmem>>, vector<8x128xf32>
    %c2 = arith.constant 2 : index
    %9 = memref.load %arg1[%c2] : memref<4xf32, #tpu.memory_space<smem>>
    %10 = vector.broadcast %9 : f32 to vector<8x128xf32>
    %11 = arith.addf %8, %10 : vector<8x128xf32>
    %c0_6 = arith.constant 0 : index
    %c0_7 = arith.constant 0 : index
    %12 = vector.load %arg5[%c0_6, %c0_7] : memref<8x128xf32, #tpu.memory_space<vmem>>, vector<8x128xf32>
    %c3 = arith.constant 3 : index
    %13 = memref.load %arg1[%c3] : memref<4xf32, #tpu.memory_space<smem>>
    %14 = vector.broadcast %13 : f32 to vector<8x128xf32>
    %15 = arith.addf %12, %14 : vector<8x128xf32>
    %16 = arith.maximumf %3, %7 : vector<8x128xf32>
    %17 = arith.maximumf %16, %11 : vector<8x128xf32>
    %18 = arith.maximumf %17, %15 : vector<8x128xf32>
    %19 = arith.subf %3, %18 : vector<8x128xf32>
    %20 = math.exp %19 : vector<8x128xf32>
    %21 = arith.subf %7, %18 : vector<8x128xf32>
    %22 = math.exp %21 : vector<8x128xf32>
    %23 = arith.addf %20, %22 : vector<8x128xf32>
    %24 = arith.subf %11, %18 : vector<8x128xf32>
    %25 = math.exp %24 : vector<8x128xf32>
    %26 = arith.addf %23, %25 : vector<8x128xf32>
    %27 = arith.subf %15, %18 : vector<8x128xf32>
    %28 = math.exp %27 : vector<8x128xf32>
    %29 = arith.addf %26, %28 : vector<8x128xf32>
    %30 = math.log %29 : vector<8x128xf32>
    %31 = arith.addf %18, %30 : vector<8x128xf32>
    %c0_8 = arith.constant 0 : index
    %c0_9 = arith.constant 0 : index
    %32 = vector.load %arg6[%c0_8, %c0_9] : memref<8x128xf32, #tpu.memory_space<vmem>>, vector<8x128xf32>
    tpu.vector_store %arg6[%c0_8, %c0_9], %31 {strides = array<i32>} : memref<8x128xf32, #tpu.memory_space<vmem>>, vector<8x128xf32>,
    return
  }
  func.func @transform_0(%arg0: i32) -> i32 {
    %c0_i32 = arith.constant 0 : i32
    %c0_i32_0 = arith.constant 0 : i32
    return %c0_i32 : i32
  }
  func.func @transform_1(%arg0: i32) -> (i32, i32) {
    %c0_i32 = arith.constant 0 : i32
    %c0_i32_0 = arith.constant 0 : i32
    return %arg0, %c0_i32 : i32, i32
  }
  func.func @transform_2(%arg0: i32) -> (i32, i32) {
    %c0_i32 = arith.constant 0 : i32
    %c0_i32_0 = arith.constant 0 : i32
    return %arg0, %c0_i32 : i32, i32
  }
  func.func @transform_3(%arg0: i32) -> (i32, i32) {
    %c0_i32 = arith.constant 0 : i32
    %c0_i32_0 = arith.constant 0 : i32
    return %arg0, %c0_i32 : i32, i32
  }
  func.func @transform_4(%arg0: i32) -> (i32, i32) {
    %c0_i32 = arith.constant 0 : i32
    %c0_i32_0 = arith.constant 0 : i32
    return %arg0, %c0_i32 : i32, i32
  }
  func.func @transform_5(%arg0: i32) -> (i32, i32) {
    %c0_i32 = arith.constant 0 : i32
    %c0_i32_0 = arith.constant 0 : i32
    return %arg0, %c0_i32 : i32, i32
  }
}

</mosaic_0001>

<bundles_post_ra>
// kernel: tpu_custom_call.1
= control target key start
LH: loop header
LB: loop body
LE: loop exit
PB: predicated region body
PF: predicated region fallthrough
CT: control target
= control target key end

     0   :  { %10 = vsyncpa [#allocation5], 0  ;;  %s362_s0 = inlined_call_operand.hbm [shape: f32[4], index: 0, kind: input, shape index: {}]   ;;  %s363_s1 = inlined_call_operand.hbm [shape: f32[8,128], index: 1, kind: input, shape index: {}]   ;;  %s364_s2 = inlined_call_operand.hbm [shape: f32[8,128], index: 2, kind: input, shape index: {}]   ;;  %s365_s3 = inlined_call_operand.hbm [shape: f32[8,128], index: 3, kind: input, shape index: {}]   ;;  %s366_s4 = inlined_call_operand.hbm [shape: f32[8,128], index: 4, kind: input, shape index: {}]   ;;  %s367_s5 = inlined_call_operand.hbm [shape: f32[8,128], index: 5, kind: output, shape index: {}]  }
   0x1   :  { %11 = vsyncpa [#allocation3], 0 }
   0x2   :  { %12 = vsyncpa [#allocation8], 0 }
   0x3   :  { %13 = vsyncpa [#allocation11], 0  ;;  %s40_s20 = sshll.u32 %s364_s2, 4  ;;  %s41_s20 = int_to_ptr.hbm [resolvable:$true] %s40_s20 }
   0x4   :  { %14 = vsyncpa [#allocation4], 0  ;;  %s308_s21 = smov [#allocation7]   ;;  %s20_s25 = sshll.u32 %s362_s0, 4  ;;  %s21_s25 = int_to_ptr.hbm [resolvable:$true] %s20_s25 }
   0x5   :  { %s42_s22 = sshll.u32 %s308_s21, 4  ;;  %s309_s26 = smov [#allocation2]   ;;  %s43_s22 = int_to_ptr.vmem [resolvable:$true] %s42_s22 }
   0x6   :  { %45 = dma.hbm_to_vmem [thread:$0]  %s41_s20, 128, %s43_s22, [#allocation8]  }
   0x7   :  { %23 = dma.hbm_to_smem %s21_s25, 16, %s309_s26, [#allocation5]  }
   0x8   :  { %s29_s29 = sshll.u32 %s363_s1, 4  ;;  %s310_s30 = smov [#allocation6]   ;;  %s30_s29 = int_to_ptr.hbm [resolvable:$true] %s29_s29 }
   0x9   :  { %s31_s2 = sshll.u32 %s310_s30, 4  ;;  %s51_s8 = sshll.u32 %s365_s3, 4  ;;  %s32_s2 = int_to_ptr.vmem [resolvable:$true] %s31_s2  ;;  %s52_s8 = int_to_ptr.hbm [resolvable:$true] %s51_s8 }
   0xa   :  { %34 = dma.hbm_to_vmem [thread:$0]  %s30_s29, 128, %s32_s2, [#allocation3]  }
   0xb   :  { %s311_s9 = smov [#allocation9]   ;;  %s62_s12 = sshll.u32 %s366_s4, 4  ;;  %s63_s12 = int_to_ptr.hbm [resolvable:$true] %s62_s12 }
   0xc   :  { %s53_s0 = sshll.u32 %s311_s9, 4  ;;  %s312_s1 = smov [#allocation10]   ;;  %s54_s0 = int_to_ptr.vmem [resolvable:$true] %s53_s0 }
   0xd   :  { %56 = dma.hbm_to_vmem [thread:$0]  %s52_s8, 128, %s54_s0, [#allocation8]  }
   0xe   :  { %s64_s13 = sshll.u32 %s312_s1, 4  ;;  %s65_s13 = int_to_ptr.vmem [resolvable:$true] %s64_s13 }
   0xf   :  { %67 = dma.hbm_to_vmem [thread:$0]  %s63_s12, 128, %s65_s13, [#allocation11]  }
  0x10   :  { %298 = dma.done.wait [#allocation5], 16  }
  0x11   :  { %299 = vsyncadd [#allocation5], 4294967280 }
  0x12   :  { %300 = dma.done.wait [#allocation3], 128  }
  0x13   :  { %301 = vsyncadd [#allocation3], 4294967168 }
  0x14   :  { %302 = dma.done.wait [#allocation8], 256  }
  0x15   :  { %303 = vsyncadd [#allocation8], 4294967040 }
  0x16   :  { %304 = dma.done.wait [#allocation11], 128  }
  0x17   :  { %305 = vsyncadd [#allocation11], 4294967168 }
  0x18   :  { %88 = sfence }
  0x19   :  { %s90_s3 = sld [smem:[#allocation2]]  ;;  %v89_v0 = vld [vmem:[#allocation6] sm:$0xff]  ;;  %v93_v1 = vld [vmem:[#allocation7] sm:$0xff]  ;;  %v97_v3 = vld [vmem:[#allocation9] sm:$0xff]  ;;  %s313_s16 = smov [#allocation12]  }
  0x1a   :  { %s147_s14 = sld [smem:[#allocation2 + $0x1]]  ;;  %v101_v6 = vld [vmem:[#allocation10] sm:$0xff]  ;;  %s132_s17 = sshll.u32 %s313_s16, 4  ;;  %s133_s17 = int_to_ptr.vmem [resolvable:$true] %s132_s17 }
  0x1b   :  { %s148_s15 = sld [smem:[#allocation2 + $0x2]]  ;;  %s134_s20 = sshll.u32 %s367_s5, 4  ;;  %s135_s20 = int_to_ptr.hbm [resolvable:$true] %s134_s20 }
  0x1c   :  { %s149_s4 = sld [smem:[#allocation2 + $0x3]] }
  0x1f   :  { %v91_v2 = vstv %s90_s3 }
  0x20   :  { %v92_v4 = vadd.f32 %v91_v2, %v89_v0  ;;  %v95_v5 = vstv %s147_s14 }
  0x21   :  { %v96_v7 = vadd.f32 %v95_v5, %v93_v1  ;;  %v99_v8 = vstv %s148_s15 }
  0x22   :  { %v100_v9 = vadd.f32 %v99_v8, %v97_v3  ;;  %v103_v10 = vstv %s149_s4 }
  0x23   :  { %v104_v11 = vadd.f32 %v103_v10, %v101_v6  ;;  %v105_v12 = vmax.f32 %v92_v4, %v96_v7 }
  0x25   :  { %v106_v13 = vmax.f32 %v105_v12, %v100_v9 }
  0x27   :  { %v107_v14 = vmax.f32 %v106_v13, %v104_v11 }
  0x29   :  { %v108_v15 = vsub.f32 %v92_v4, %v107_v14  ;;  %v111_v16 = vsub.f32 %v96_v7, %v107_v14  ;;  %v115_v17 = vsub.f32 %v100_v9, %v107_v14  ;;  %v119_v18 = vsub.f32 %v104_v11, %v107_v14 }
  0x2b   :  { %v109_v19 = vmul.f32 1.442695, %v108_v15  ;;  %v112_v20 = vmul.f32 1.442695, %v111_v16  ;;  %v116_v21 = vmul.f32 1.442695, %v115_v17 }
  0x2c   :  { %v120_v22 = vmul.f32 1.442695, %v119_v18 }
  0x2d   :  { %156 = vpow2.f32 %v109_v19 }
  0x2e   :  { %158 = vpow2.f32 %v112_v20 }
  0x2f   :  { %160 = vpow2.f32 %v116_v21 }
  0x30   :  { %162 = vpow2.f32 %v120_v22 }
  0x33   :  { %v157_v23 = vpop.eup %156 }
  0x34   :  { %v159_v24 = vpop.eup %158 }
  0x35   :  { %v161_v25 = vpop.eup %160  ;;  %v114_v26 = vadd.f32 %v159_v24, %v157_v23 }
  0x36   :  { %v163_v27 = vpop.eup %162 }
  0x37   :  { %v118_v28 = vadd.f32 %v161_v25, %v114_v26 }
  0x39   :  { %v122_v29 = vadd.f32 %v163_v27, %v118_v28 }
  0x3b   :  { %164 = vlog2.f32 %v122_v29 }
  0x41   :  { %v165_v30 = vpop.eup %164 }
  0x42   :  { %v124_v31 = vmul.f32 0.6931472, %v165_v30 }
  0x44   :  { %v125_v32 = vadd.f32 %v124_v31, %v107_v14 }
  0x46   :  { %126 = vst [vmem:[#allocation12] sm:$0xff] %v125_v32 }
  0x47   :  { %137 = dma.vmem_to_hbm [thread:$0]  %s133_s17, 128, %s135_s20, [#allocation4]  }
  0x48   :  { %306 = dma.done.wait [#allocation4], 128  }
  0x49   :  { %307 = vsyncadd [#allocation4], 4294967168 }
  0x4a   :  { %142 = vsyncpa [#allocation3], 1 }
  0x4b   :  { %143 = vsyncpa [#allocation8], 1 }
  0x4c   :  { %144 = vsyncpa [#allocation11], 1 }
  0x4d   :  { %145 = vsyncpa [#allocation4], 1 }
  0x4e   :  { %146 = vsyncpa [#allocation5], 1 }

</bundles_post_ra>
